<compile_context>
chip_gen: v6e
topology: v6e:2x2x1
jax: 0.10.0
libtpu: 0.0.40
codegen_flags: <defaults>
</compile_context>

<pallas_src>
import functools

import jax
import jax.numpy as jnp
from jax.experimental import pallas as pl
from jax.experimental.pallas import tpu as pltpu

_LANE = 128                 # lane width (last dim of a vreg)
_SUBLANE = 8                # sublane count (second-to-last dim of a vreg)
_DEFAULT_BATCH_TILE = 512   # rows per grid step on the large-batch path


def _round_up(x, m):
    return ((x + m - 1) // m) * m


def _fused_xtoc_kernel(x_ref, w_ref, b_ref, o_ref):
    # x_ref: (Bt, D)  f32 activations (whole array or one batch tile)
    # w_ref: (D, Np)  bf16 fused per-head weights, lane-padded to Np
    # b_ref: (1, Np)  f32 fused per-head biases, lane-padded to Np
    # o_ref: (Bt, Np) f32 fused logits for every head
    x = x_ref[...].astype(w_ref.dtype)                       # bf16 MXU inputs
    acc = jnp.dot(x, w_ref[...], preferred_element_type=jnp.float32)
    o_ref[...] = (acc + b_ref[...]).astype(o_ref.dtype)      # f32 bias/accumulate path


def pack_params(w_stack, b_stack, weight_dtype=jnp.bfloat16):
    """One-time packing of per-head Linear params (call once at init, NOT per forward).

    Args:
      w_stack: (H, D, C) stacked per-head weights, (in, out) layout.
      b_stack: (H, C)    stacked per-head biases.
    Returns:
      w_packed: (D, Np) weight_dtype, heads fused along lanes, zero-padded to 128.
      b_packed: (1, Np) float32 fused bias, zero-padded to 128.
    """
    H, D, C = w_stack.shape
    assert b_stack.shape == (H, C)
    N = H * C
    Np = _round_up(N, _LANE)
    w_all = jnp.transpose(w_stack, (1, 0, 2)).reshape(D, N).astype(weight_dtype)
    w_packed = jnp.zeros((D, Np), weight_dtype).at[:, :N].set(w_all)
    b_packed = jnp.zeros((1, Np), jnp.float32).at[:, :N].set(
        b_stack.reshape(1, N).astype(jnp.float32))
    return w_packed, b_packed


def _fused_forward(x, w_packed, b_packed, batch_tile):
    B, D = x.shape
    Np = w_packed.shape[1]
    cost = pl.CostEstimate(
        flops=2 * B * D * Np,
        transcendentals=0,
        bytes_accessed=(4 * B * D                       # x (f32)
                        + w_packed.dtype.itemsize * D * Np  # fused W
                        + 4 * Np                        # bias
                        + 4 * B * Np),                  # out
    )

    if B >= 2 * batch_tile:
        # Large-batch path: tile the batch so a single x block never blows
        # v7x's 64 MiB VMEM, overlap x-tile DMA with MXU compute, and let
        # megacore shard the batch across TensorCores. W/bias index is
        # constant -> stays resident across the grid.
        TB = batch_tile
        Bp = _round_up(B, TB)
        x_in = x if Bp == B else jnp.zeros((Bp, D), x.dtype).at[:B, :].set(x)
        out = pl.pallas_call(
            _fused_xtoc_kernel,
            out_shape=jax.ShapeDtypeStruct((Bp, Np), jnp.float32),
            grid=(Bp // TB,),
            in_specs=[
                pl.BlockSpec((TB, D), lambda i: (i, 0)),   # x batch tile
                pl.BlockSpec((D, Np), lambda i: (0, 0)),   # fused W (resident)
                pl.BlockSpec((1, Np), lambda i: (0, 0)),   # fused bias (resident)
            ],
            out_specs=pl.BlockSpec((TB, Np), lambda i: (i, 0)),
            compiler_params=pltpu.CompilerParams(
                dimension_semantics=("parallel",)),
            cost_estimate=cost,
        )(x_in, w_packed, b_packed)
        return out[:B]

    # Small-batch path: no grid, whole-array single-buffered VMEM operands.
    # Full-array blocks are exempt from (8,128) divisibility, so x needs no
    # sublane padding copy; only the fused lane dimension Np is 128-padded.
    return pl.pallas_call(
        _fused_xtoc_kernel,
        out_shape=jax.ShapeDtypeStruct((B, Np), jnp.float32),
        in_specs=[
            pl.BlockSpec(memory_space=pltpu.MemorySpace.VMEM),
            pl.BlockSpec(memory_space=pltpu.MemorySpace.VMEM),
            pl.BlockSpec(memory_space=pltpu.MemorySpace.VMEM),
        ],
        out_specs=pl.BlockSpec(memory_space=pltpu.MemorySpace.VMEM),
        cost_estimate=cost,
    )(x, w_packed, b_packed)


@functools.partial(jax.jit, static_argnames=("num_heads", "num_classes", "batch_tile"))
def _forward_heads(x, w_packed, b_packed, *, num_heads, num_classes,
                   batch_tile=_DEFAULT_BATCH_TILE):
    out = _fused_forward(x, w_packed, b_packed, batch_tile)      # (B, Np)
    N = num_heads * num_classes
    out3 = out[:, :N].reshape(x.shape[0], num_heads, num_classes)
    # Split per head inside the same jit (single compiled program, no extra
    # tiny launches from the caller).
    return tuple(out3[:, h, :] for h in range(num_heads))


def model_x_to_c_forward(x, w_packed, b_packed, *, num_heads, num_classes,
                         batch_tile=_DEFAULT_BATCH_TILE):
    """Pallas forward for ModelXtoC. Returns a list of H (B, C) logits arrays,
    matching the PyTorch module's output list."""
    return list(_forward_heads(x, w_packed, b_packed, num_heads=num_heads,
                               num_classes=num_classes, batch_tile=batch_tile))


def init_params(key, num_heads, dim, num_classes, dtype=jnp.float32):
    """Deterministic synthetic init mimicking torch.nn.Linear's uniform init."""
    kw, kb = jax.random.split(key)
    bound = 1.0 / jnp.sqrt(dim)
    w = jax.random.uniform(
        kw, (num_heads, dim, num_classes), dtype, minval=-bound, maxval=bound)
    b = jax.random.uniform(
        kb, (num_heads, num_classes), dtype, minval=-bound, maxval=bound)
    return w, b


if __name__ == "__main__":
    # Shapes implied by the module: dim = 768 (Lstm=False), n_attributes = 4,
    # heads = 1 + n_attributes = 5 (not bottleneck -> class head + per-attribute).
    B = 8
    DIM = 768
    NUM_CLASSES = 5
    N_ATTRIBUTES = 4
    H = 1 + N_ATTRIBUTES

    key = jax.random.PRNGKey(0)
    kx, kp = jax.random.split(key)
    x = jax.random.normal(kx, (B, DIM), jnp.float32)
    w_stack, b_stack = init_params(kp, H, DIM, NUM_CLASSES)

    # One-time packing, hoisted out of the forward path.
    w_packed, b_packed = pack_params(w_stack, b_stack)

    # --- small-batch path (no grid, single-buffered whole-array VMEM) ---
    outs = model_x_to_c_forward(x, w_packed, b_packed,
                                num_heads=H, num_classes=NUM_CLASSES)
    outs = [jax.block_until_ready(o) for o in outs]

    # Pure-JAX f32 reference; bf16 weights/activations -> loose tolerance.
    ref = [x @ w_stack[h] + b_stack[h] for h in range(H)]
    for o, r in zip(outs, ref):
        assert o.shape == (B, NUM_CLASSES)
        assert jnp.allclose(o, r, atol=5e-2, rtol=5e-2), \
            float(jnp.max(jnp.abs(o - r)))

    # --- batch-tiled path (v7x-VMEM-safe / megacore), exercised at a small tile ---
    B2 = 260  # not a multiple of the tile -> exercises the row padding
    x2 = jax.random.normal(jax.random.PRNGKey(1), (B2, DIM), jnp.float32)
    outs2 = model_x_to_c_forward(x2, w_packed, b_packed,
                                 num_heads=H, num_classes=NUM_CLASSES,
                                 batch_tile=128)
    outs2 = [jax.block_until_ready(o) for o in outs2]
    ref2 = [x2 @ w_stack[h] + b_stack[h] for h in range(H)]
    for o, r in zip(outs2, ref2):
        assert o.shape == (B2, NUM_CLASSES)
        assert jnp.allclose(o, r, atol=5e-2, rtol=5e-2), \
            float(jnp.max(jnp.abs(o - r)))

    # TODO(synk): aux_logits branch (np.save of aux logits) is file I/O, and the
    # unused connect_CY / bottleneck / expand_dim branches are omitted (default config).
    print("KERNEL_OK")
</pallas_src>

<mosaic_0001>
module attributes {stable_mosaic.version = 11 : i64} {
  func.func @_fused_xtoc_kernel(%arg0: memref<8x768xf32, #tpu.memory_space<vmem>>, %arg1: memref<768x128xbf16, #tpu.memory_space<vmem>>, %arg2: memref<1x128xf32, #tpu.memory_space<vmem>>, %arg3: memref<8x128xf32, #tpu.memory_space<vmem>>) attributes {dimension_semantics = [], scalar_prefetch = 0 : i64, scratch_operands = 0 : i64, tpu.core_type = #tpu.core_type<tc>} {
    %c0 = arith.constant 0 : index
    %c0_0 = arith.constant 0 : index
    %0 = vector.load %arg0[%c0, %c0_0] : memref<8x768xf32, #tpu.memory_space<vmem>>, vector<8x768xf32>
    %1 = arith.truncf %0 : vector<8x768xf32> to vector<8x768xbf16>
    %c0_1 = arith.constant 0 : index
    %c0_2 = arith.constant 0 : index
    %2 = vector.load %arg1[%c0_1, %c0_2] : memref<768x128xbf16, #tpu.memory_space<vmem>>, vector<768x128xbf16>
    %cst = arith.constant dense<0.000000e+00> : vector<8x128xf32>
    %3 = tpu.matmul %1, %2, %cst {dimension_numbers = #tpu.dot_dimension_numbers<[1], [0], [0], [1], [0, 0, 1, 1], [], []>} : vector<8x768xbf16>, vector<768x128xbf16>, vector<8x128xf32> -> vector<8x128xf32>
    %c0_3 = arith.constant 0 : index
    %c0_4 = arith.constant 0 : index
    %4 = vector.load %arg2[%c0_3, %c0_4] : memref<1x128xf32, #tpu.memory_space<vmem>>, vector<1x128xf32>
    %5 = vector.broadcast %4 : vector<1x128xf32> to vector<8x128xf32>
    %6 = arith.addf %3, %5 : vector<8x128xf32>
    %c0_5 = arith.constant 0 : index
    %c0_6 = arith.constant 0 : index
    %7 = vector.load %arg3[%c0_5, %c0_6] : memref<8x128xf32, #tpu.memory_space<vmem>>, vector<8x128xf32>
    tpu.vector_store %arg3[%c0_5, %c0_6], %6 {strides = array<i32>} : memref<8x128xf32, #tpu.memory_space<vmem>>, vector<8x128xf32>,
    return
  }
}

</mosaic_0001>

<bundles_post_ra>
// kernel: _forward_heads.1
= control target key start
LH: loop header
LB: loop body
LE: loop exit
PB: predicated region body
PF: predicated region fallthrough
CT: control target
= control target key end

     0   :  { %8 = vsyncpa [#allocation3], 0  ;;  %s818_s0 = inlined_call_operand.hbm [shape: f32[8,768], index: 0, kind: input, shape index: {}]   ;;  %s819_s1 = inlined_call_operand.hbm [shape: bf16[768,128], index: 1, kind: input, shape index: {}]   ;;  %s820_s2 = inlined_call_operand.vmem [shape: f32[1,128], index: 2, kind: input, shape index: {}]   ;;  %s821_s3 = inlined_call_operand.vmem [shape: f32[8,128], index: 3, kind: output, shape index: {}]  }
   0x1   :  { %9 = vsyncpa [#allocation5], 0  ;;  %s782_s12 = smov [#allocation2]   ;;  %s783_s14 = smov [#allocation4]  }
   0x2   :  { %s16_s13 = sshll.u32 %s782_s12, 4  ;;  %s25_s15 = sshll.u32 %s783_s14, 4  ;;  %s17_s13 = int_to_ptr.vmem [resolvable:$true] %s16_s13  ;;  %s26_s15 = int_to_ptr.vmem [resolvable:$true] %s25_s15 }
   0x3   :  { %s746_s16 = scalar_lea.vmem %s17_s13, 768  ;;  %p751_p1 = scmp.lt.s32.totalorder %s17_s13, %s17_s13 }
   0x4   :  { %p747_p0 = scmp.ne.s32.totalorder %s17_s13, %s746_s16  ;;  %p752_p2 = scmp.lt.s32.totalorder %s746_s16, %s746_s16 }
   0x6   :  { %p753_p3 = por %p752_p2, %p751_p1 }
   0x8   :  { %p754_p4 = pnand %p753_p3, %p747_p0 }
   0xa   :  { %757 = shalt.err (!%p754_p4)
}
   0xb   :  { %19 = dma.hbm_to_vmem [thread:$0]  %s818_s0, 768, %s17_s13, [#allocation3]  }
   0xc   :  { %s766_s19 = scalar_lea.vmem %s26_s15, 6144  ;;  %p771_p6 = scmp.lt.s32.totalorder %s26_s15, %s26_s15 }
   0xd   :  { %p767_p5 = scmp.ne.s32.totalorder %s26_s15, %s766_s19  ;;  %p772_p7 = scmp.lt.s32.totalorder %s766_s19, %s766_s19 }
   0xf   :  { %p773_p8 = por %p772_p7, %p771_p6 }
  0x11   :  { %p774_p9 = pnand %p773_p8, %p767_p5 }
  0x13   :  { %777 = shalt.err (!%p774_p9)
}
  0x14   :  { %s784_s20 = smov 64   ;;  %s785_s21 = smov 4  }
  0x15   :  { %31 = dma.hbm_to_vmem [thread:$0]  %s819_s1, 6144, %s26_s15, [#allocation5], %s784_s20, %s784_s20, %s785_s21  }
  0x16   :  { %778 = dma.done.wait [#allocation3], 768  }
  0x17   :  { %779 = vsyncadd [#allocation3], 4294966528 }
  0x18   :  { %780 = dma.done.wait [#allocation5], 6144  }
  0x19   :  { %781 = vsyncadd [#allocation5], 4294961152  ;;  %v690_v0 = vld [vmem:[#allocation4 + $0x78] sm:$0xff]   ;;  %v694_v4 = vld [vmem:[#allocation4 + $0x70] sm:$0xff]  }
  0x1a   :  { %v691_v1 = vld [vmem:[#allocation4 + $0x38] sm:$0xff]   ;;  %620 = vmatprep.subr.bf16.mxu0 %v690_v0  ;;  %v695_v5 = vld [vmem:[#allocation4 + $0x30] sm:$0xff]   ;;  %v698_v8 = vld [vmem:[#allocation4 + $0x68] sm:$0xff]  }
  0x1b   :  { %v692_v2 = vld [vmem:[#allocation4 + $0xf8] sm:$0xff]   ;;  %621 = vmatpush3.bf16.msra.mxu0 %v691_v1  ;;  %v696_v6 = vld [vmem:[#allocation4 + $0xf0] sm:$0xff]   ;;  %v699_v9 = vld [vmem:[#allocation4 + $0x28] sm:$0xff]  }
  0x1c   :  { %v693_v3 = vld [vmem:[#allocation4 + $0xb8] sm:$0xff]   ;;  %642 = vmatprep.subr.bf16.mxu1 %v692_v2  ;;  %622 = vmatprep.subr.bf16.mxu0 %v694_v4  ;;  %v697_v7 = vld [vmem:[#allocation4 + $0xb0] sm:$0xff]   ;;  %v700_v10 = vld [vmem:[#allocation4 + $0xe8] sm:$0xff]  }
  0x1d   :  { %643 = vmatpush3.bf16.msra.mxu1 %v693_v3  ;;  %v701_v11 = vld [vmem:[#allocation4 + $0xa8] sm:$0xff]   ;;  %v702_v12 = vld [vmem:[#allocation4 + $0x60] sm:$0xff]   ;;  %v706_v16 = vld [vmem:[#allocation4 + $0x58] sm:$0xff]  }
  0x1e   :  { %644 = vmatprep.subr.bf16.mxu1 %v696_v6  ;;  %v703_v13 = vld [vmem:[#allocation4 + $0x20] sm:$0xff]   ;;  %v707_v17 = vld [vmem:[#allocation4 + $0x18] sm:$0xff]   ;;  %v710_v20 = vld [vmem:[#allocation4 + $0x50] sm:$0xff]  }
  0x1f   :  { %623 = vmatpush3.bf16.msra.mxu0 %v695_v5  ;;  %v704_v14 = vld [vmem:[#allocation4 + $0xe0] sm:$0xff]   ;;  %v708_v18 = vld [vmem:[#allocation4 + $0xd8] sm:$0xff]   ;;  %v711_v21 = vld [vmem:[#allocation4 + $0x10] sm:$0xff]  }
  0x20   :  { %624 = vmatprep.subr.bf16.mxu0 %v698_v8  ;;  %v705_v15 = vld [vmem:[#allocation4 + $0xa0] sm:$0xff]   ;;  %v709_v19 = vld [vmem:[#allocation4 + $0x98] sm:$0xff]   ;;  %v712_v22 = vld [vmem:[#allocation4 + $0xd0] sm:$0xff]  }
  0x21   :  { %645 = vmatpush3.bf16.msra.mxu1 %v697_v7  ;;  %v713_v23 = vld [vmem:[#allocation4 + $0x90] sm:$0xff]   ;;  %v714_v24 = vld [vmem:[#allocation4 + $0x48] sm:$0xff]   ;;  %v718_v28 = vld [vmem:[#allocation4 + $0x40] sm:$0xff]  }
  0x22   :  { %646 = vmatprep.subr.bf16.mxu1 %v700_v10  ;;  %v715_v25 = vld [vmem:[#allocation4 + $0x8] sm:$0xff]   ;;  %v719_v29 = vld [vmem:[#allocation4] sm:$0xff]   ;;  %v42_v31 = vld [vmem:[#allocation2 + $0x8] sm:$0xff] }
  0x23   :  { %625 = vmatpush3.bf16.msra.mxu0 %v699_v9  ;;  %v716_v26 = vld [vmem:[#allocation4 + $0xc8] sm:$0xff]   ;;  %v720_v30 = vld [vmem:[#allocation4 + $0xc0] sm:$0xff]   ;;  %v48_v32 = vpack.c.bf16 %v42_v31, %v42_v31  ;;  %v41_v34 = vld [vmem:[#allocation2] sm:$0xff] }
  0x24   :  { %626 = vmatprep.subr.bf16.mxu0 %v702_v12  ;;  %v717_v27 = vld [vmem:[#allocation4 + $0x88] sm:$0xff]   ;;  %v721_v33 = vld [vmem:[#allocation4 + $0x80] sm:$0xff]   ;;  %v47_v35 = vpack.c.bf16 %v41_v34, %v41_v34  ;;  %v722_v36 = vld [vmem:[#allocation4 + $0x178] sm:$0xff]  }
  0x25   :  { %647 = vmatpush3.bf16.msra.mxu1 %v701_v11  ;;  %v44_v37 = vld [vmem:[#allocation2 + $0x18] sm:$0xff]  ;;  %476 = vmatprep.mubr.bf16.mxu0 %v48_v32  ;;  %v723_v39 = vld [vmem:[#allocation4 + $0x138] sm:$0xff]   ;;  %v43_v40 = vld [vmem:[#allocation2 + $0x10] sm:$0xff] }
  0x26   :  { %648 = vmatprep.subr.bf16.mxu1 %v704_v14  ;;  %v50_v38 = vpack.c.bf16 %v44_v37, %v44_v37  ;;  %v49_v41 = vpack.c.bf16 %v43_v40, %v43_v40  ;;  %v724_v42 = vld [vmem:[#allocation4 + $0x170] sm:$0xff]   ;;  %v726_v44 = vld [vmem:[#allocation4 + $0x168] sm:$0xff]   ;;  %v728_v46 = vld [vmem:[#allocation4 + $0x160] sm:$0xff]  }
  0x27   :  { %627 = vmatpush3.bf16.msra.mxu0 %v703_v13  ;;  %v725_v43 = vld [vmem:[#allocation4 + $0x130] sm:$0xff]   ;;  %v727_v45 = vld [vmem:[#allocation4 + $0x128] sm:$0xff]   ;;  %v729_v47 = vld [vmem:[#allocation4 + $0x120] sm:$0xff]  }
  0x28   :  { %628 = vmatprep.subr.bf16.mxu0 %v706_v16  ;;  %516 = vmatprep.mubr.bf16.mxu1 %v50_v38  ;;  %v730_v48 = vld [vmem:[#allocation4 + $0x158] sm:$0xff]   ;;  %v732_v50 = vld [vmem:[#allocation4 + $0x150] sm:$0xff]   ;;  %v734_v54 = vld [vmem:[#allocation4 + $0x148] sm:$0xff]  }
  0x29   :  { %649 = vmatpush3.bf16.msra.mxu1 %v705_v15  ;;  %v731_v49 = vld [vmem:[#allocation4 + $0x118] sm:$0xff]   ;;  %v733_v53 = vld [vmem:[#allocation4 + $0x110] sm:$0xff]   ;;  %v735_v55 = vld [vmem:[#allocation4 + $0x108] sm:$0xff]  }
  0x2a   :  { %650 = vmatprep.subr.bf16.mxu1 %v708_v18  ;;  %v46_v51 = vld [vmem:[#allocation2 + $0x28] sm:$0xff]  ;;  %v736_v56 = vld [vmem:[#allocation4 + $0x140] sm:$0xff]   ;;  %v45_v58 = vld [vmem:[#allocation2 + $0x20] sm:$0xff] }
  0x2b   :  { %629 = vmatpush3.bf16.msra.mxu0 %v707_v17  ;;  %v52_v52 = vpack.c.bf16 %v46_v51, %v46_v51  ;;  %v737_v57 = vld [vmem:[#allocation4 + $0x100] sm:$0xff]   ;;  %v51_v59 = vpack.c.bf16 %v45_v58, %v45_v58  ;;  %v571_v5 = vld [vmem:[%s820_s2] ss:$0 sm:$0xff] }
  0x2c   :  { %630 = vmatprep.subr.bf16.mxu0 %v710_v20 }
  0x2d   :  { %651 = vmatpush3.bf16.msra.mxu1 %v709_v19 }
  0x2e   :  { %652 = vmatprep.subr.bf16.mxu1 %v712_v22 }
  0x2f   :  { %631 = vmatpush3.bf16.msra.mxu0 %v711_v21 }
  0x30   :  { %632 = vmatprep.subr.bf16.mxu0 %v714_v24 }
  0x31   :  { %653 = vmatpush3.bf16.msra.mxu1 %v713_v23 }
  0x32   :  { %654 = vmatprep.subr.bf16.mxu1 %v716_v26 }
  0x33   :  { %633 = vmatpush3.bf16.msra.mxu0 %v715_v25 }
  0x34   :  { %634 = vmatprep.subr.bf16.mxu0 %v718_v28 }
  0x35   :  { %655 = vmatpush3.bf16.msra.mxu1 %v717_v27 }
  0x36   :  { %656 = vmatprep.subr.bf16.mxu1 %v720_v30 }
  0x37   :  { %635 = vmatpush3.bf16.msra.mxu0 %v719_v29 }
  0x38   :  { %664 = vmatprep.subr.bf16.mxu0 %v722_v36 }
  0x39   :  { %657 = vmatpush3.bf16.msra.mxu1 %v721_v33 }
  0x3a   :  { %477 = vmatmul.mubr.bf16.vlgmr.msra.gmra.mxu0 %v47_v35 }
  0x3b   :  { %665 = vmatpush3.bf16.msra.mxu0 %v723_v39  ;;  %556 = vmatprep.mubr.bf16.mxu0 %v52_v52 }
  0x3c   :  { %517 = vmatmul.mubr.bf16.vlgmr.msra.gmra.mxu1 %v49_v41  ;;  %666 = vmatprep.subr.bf16.mxu0 %v724_v42 }
  0x3f   :  { %667 = vmatpush3.bf16.msra.mxu0 %v725_v43 }
  0x40   :  { %668 = vmatprep.subr.bf16.mxu0 %v726_v44 }
  0x43   :  { %669 = vmatpush3.bf16.msra.mxu0 %v727_v45 }
  0x44   :  { %670 = vmatprep.subr.bf16.mxu0 %v728_v46 }
  0x47   :  { %671 = vmatpush3.bf16.msra.mxu0 %v729_v47 }
  0x48   :  { %672 = vmatprep.subr.bf16.mxu0 %v730_v48 }
  0x4b   :  { %673 = vmatpush3.bf16.msra.mxu0 %v731_v49 }
  0x4c   :  { %674 = vmatprep.subr.bf16.mxu0 %v732_v50 }
  0x4f   :  { %675 = vmatpush3.bf16.msra.mxu0 %v733_v53 }
  0x50   :  { %676 = vmatprep.subr.bf16.mxu0 %v734_v54 }
  0x53   :  { %677 = vmatpush3.bf16.msra.mxu0 %v735_v55 }
  0x54   :  { %678 = vmatprep.subr.bf16.mxu0 %v736_v56 }
  0x57   :  { %679 = vmatpush3.bf16.msra.mxu0 %v737_v57 }
  0x5a   :  { %557 = vmatmul.mubr.bf16.vlgmr.msra.gmra.mxu0 %v51_v59 }
  0xfa   :  { %v636_v60 = vpop.f32.mrf.mxu0 }
  0xfc   :  { %v637_v61 = vpop.f32.mrf.mxu0  ;;  %v658_v62 = vpop.f32.mrf.mxu1 }
  0xfd   :  { %v638_v4 = vadd.f32 %v637_v61, %v636_v60 }
  0xfe   :  { %v639_v63 = vpop.f32.mrf.mxu0  ;;  %v659_v0 = vpop.f32.mrf.mxu1 }
  0xff   :  { %v479_v6 = vadd.f32 %v638_v4, %v571_v5  ;;  %v660_v7 = vadd.f32 %v659_v0, %v658_v62 }
 0x100   :  { %v640_v1 = vpop.f32.mrf.mxu0  ;;  %v661_v2 = vpop.f32.mrf.mxu1 }
 0x101   :  { %v519_v10 = vadd.f32 %v660_v7, %v479_v6 }
 0x102   :  { %v662_v3 = vpop.f32.mrf.mxu1 }
 0x11a   :  { %v680_v8 = vpop.f32.mrf.mxu0 }
 0x11c   :  { %v681_v9 = vpop.f32.mrf.mxu0 }
 0x11d   :  { %v682_v11 = vadd.f32 %v681_v9, %v680_v8 }
 0x11e   :  { %v683_v12 = vpop.f32.mrf.mxu0 }
 0x11f   :  { %v559_v13 = vadd.f32 %v682_v11, %v519_v10 }
 0x120   :  { %v684_v14 = vpop.f32.mrf.mxu0 }
 0x121   :  { %564 = vst [vmem:[%s821_s3] sm:$0xff] %v559_v13 }
 0x122   :  { %569 = vsyncpa [#allocation3], 1 }
 0x123   :  { %570 = vsyncpa [#allocation5], 1 }

</bundles_post_ra>
